<compile_context>
chip_gen: v7x
topology: tpu7x:2x2x1
jax: 0.10.0
libtpu: 0.0.40
codegen_flags: <defaults>
</compile_context>

<pallas_src>
import functools

import jax
import jax.numpy as jnp
from jax.experimental import pallas as pl
from jax.experimental.pallas import tpu as pltpu

# ---- hyperparameters from the PyTorch module -------------------------------
CNN_OUTPUT_DIM = 512   # hp.cnn_output_dim
NUM_CLASSES = 4        # nn.Linear(hp.cnn_output_dim, 4)

# synthetic backbone config
CONV_OUT = 16
KH = KW = 3

# lane-width padding for dense (unmasked) MXU operands / stores
CO_PAD = 128           # CONV_OUT padded to lane width
NC_PAD = 128           # NUM_CLASSES padded to lane width


# ---- Pallas kernel ----------------------------------------------------------
def cnn_classifier_kernel(x_ref, wc_ref, bc_ref, w1_ref, b1_ref, w2_ref,
                          b2_ref, out_ref, pooled_ref, *, hw, sub):
    # x_ref     : (tn*hw, 9*C)    bf16  lane-dense im2col patches
    # wc_ref    : (9*C, CO_PAD)   bf16  fused 3x3 conv weights (out-ch padded)
    # bc_ref    : (1, CO_PAD)     f32
    # w1_ref    : (CO_PAD, 512)   bf16  pre-scaled by 1/(H*W) (mean folded in)
    # b1_ref    : (1, 512)        f32
    # w2_ref    : (512, NC_PAD)   bf16  classes zero-padded to 128
    # b2_ref    : (1, NC_PAD)     f32
    # out_ref   : (1, tn, NC_PAD) f32
    # pooled_ref: (tn, CO_PAD)    f32   VMEM scratch holding per-sample sums
    tn, co = pooled_ref.shape
    rows = sub * hw
    num_chunks = tn // sub

    # Fused conv (single K=9*C MXU matmul) + bias + ReLU + sum-pool, chunked
    # over `sub` samples so only a (sub*hw, CO_PAD) f32 intermediate is live.
    def body(j, carry):
        r0 = pl.multiple_of(j * rows, rows)
        conv = jnp.dot(x_ref[pl.ds(r0, rows), :], wc_ref[...],
                       preferred_element_type=jnp.float32)
        conv = jnp.maximum(conv + bc_ref[...], 0.0)          # ReLU (VPU, f32)
        p0 = pl.multiple_of(j * sub, sub)
        pooled_ref[pl.ds(p0, sub), :] = conv.reshape(sub, hw, co).sum(axis=1)
        return carry

    jax.lax.fori_loop(0, num_chunks, body, 0, unroll=True)

    # backbone fc -> cnn_output_dim features (the 1/(H*W) factor lives in w1)
    feats = jnp.dot(pooled_ref[...].astype(jnp.bfloat16), w1_ref[...],
                    preferred_element_type=jnp.float32) + b1_ref[...]
    feats = jnp.maximum(feats, 0.0)                          # (tn, 512) f32

    # classifier: nn.Linear(512, 4), padded to a dense 128-lane store
    out_ref[0] = (jnp.dot(feats.astype(jnp.bfloat16), w2_ref[...],
                          preferred_element_type=jnp.float32) + b2_ref[...])


# ---- wrapper ----------------------------------------------------------------
def im2col_3x3_same(x_nhwc):
    """Extract 3x3 'same' patches.  x: (N,H,W,C) -> (N, H*W, 9*C)."""
    n, h, w, c = x_nhwc.shape
    xp = jnp.pad(x_nhwc, ((0, 0), (1, 1), (1, 1), (0, 0)))
    cols = []
    for i in range(KH):
        for j in range(KW):
            cols.append(xp[:, i:i + h, j:j + w, :])
    patches = jnp.concatenate(cols, axis=-1)
    return patches.reshape(n, h * w, KH * KW * c)


def cnn_classifier_forward(x_nchw, params, *, tn=64, sub=8):
    """x_nchw: (N, C, H, W) float32 -> logits (N, NUM_CLASSES) float32.

    tn: samples per grid step (64 works on all generations; v5e/v6e can go
        128+ with their 128 MiB VMEM).  sub: samples per in-kernel pool chunk.
    """
    wc, bc, w1, b1, w2, b2 = params      # original (unpadded) f32 parameters
    n, c, h, w = x_nchw.shape
    hw = h * w
    kd = KH * KW * c

    # ---- tile-size selection -------------------------------------------
    tn = max(1, min(tn, n))
    if n >= 2 and pl.cdiv(n, tn) < 2:
        tn = pl.cdiv(n, 2)               # >=2 grid steps -> both v7x TCs busy
    sub = max(1, min(sub, tn))
    tn = max(sub, (tn // sub) * sub)     # tn multiple of the pool chunk
    num_tiles = pl.cdiv(n, tn)
    n_pad = num_tiles * tn

    # ---- lane-dense im2col operand (bf16) -------------------------------
    x_nhwc = jnp.transpose(x_nchw, (0, 2, 3, 1))
    if n_pad != n:
        x_nhwc = jnp.pad(x_nhwc, ((0, n_pad - n), (0, 0), (0, 0), (0, 0)))
    patches = im2col_3x3_same(x_nhwc)                     # (n_pad, hw, 9*C)
    x2d = patches.reshape(n_pad * hw, kd).astype(jnp.bfloat16)

    # ---- parameters: pad to 128 lanes, bf16 MXU operands ----------------
    wc_p = jnp.zeros((kd, CO_PAD), jnp.float32).at[:, :CONV_OUT].set(wc)
    wc_p = wc_p.astype(jnp.bfloat16)
    bc_p = jnp.zeros((1, CO_PAD), jnp.float32).at[:, :CONV_OUT].set(bc)

    # Fold the mean-pool 1/(H*W) into w1 (kernel does a sum pool); pad rows.
    w1_p = jnp.zeros((CO_PAD, CNN_OUTPUT_DIM), jnp.float32)
    w1_p = w1_p.at[:CONV_OUT, :].set(w1 / hw).astype(jnp.bfloat16)
    b1_p = b1.astype(jnp.float32)

    w2_p = jnp.zeros((CNN_OUTPUT_DIM, NC_PAD), jnp.float32)
    w2_p = w2_p.at[:, :NUM_CLASSES].set(w2).astype(jnp.bfloat16)
    b2_p = jnp.zeros((1, NC_PAD), jnp.float32).at[:, :NUM_CLASSES].set(b2)

    # ---- VMEM budget: 2x input tile (lane-padded) + live conv chunk + slack
    x_tile_bytes = tn * hw * 128 * 2       # bf16 tile, minor dim padded to 128
    chunk_bytes = sub * hw * CO_PAD * 4    # live f32 conv chunk
    vmem_bytes = 2 * x_tile_bytes + 2 * chunk_bytes + 4 * 1024 * 1024
    vmem_bytes = int(min(max(vmem_bytes, 8 * 1024 * 1024), 32 * 1024 * 1024))

    kernel = functools.partial(cnn_classifier_kernel, hw=hw, sub=sub)

    out_tiles = pl.pallas_call(
        kernel,
        out_shape=jax.ShapeDtypeStruct((num_tiles, tn, NC_PAD), jnp.float32),
        grid_spec=pltpu.PrefetchScalarGridSpec(
            num_scalar_prefetch=0,
            grid=(num_tiles,),
            in_specs=[
                pl.BlockSpec((tn * hw, kd), lambda i: (i, 0)),
                pl.BlockSpec((kd, CO_PAD), lambda i: (0, 0)),
                pl.BlockSpec((1, CO_PAD), lambda i: (0, 0)),
                pl.BlockSpec((CO_PAD, CNN_OUTPUT_DIM), lambda i: (0, 0)),
                pl.BlockSpec((1, CNN_OUTPUT_DIM), lambda i: (0, 0)),
                pl.BlockSpec((CNN_OUTPUT_DIM, NC_PAD), lambda i: (0, 0)),
                pl.BlockSpec((1, NC_PAD), lambda i: (0, 0)),
            ],
            out_specs=pl.BlockSpec((1, tn, NC_PAD), lambda i: (i, 0, 0)),
            scratch_shapes=[pltpu.VMEM((tn, CO_PAD), jnp.float32)],
        ),
        compiler_params=pltpu.CompilerParams(
            dimension_semantics=("parallel",),   # megacore sharding on v7x
            vmem_limit_bytes=vmem_bytes,
        ),
    )(x2d, wc_p, bc_p, w1_p, b1_p, w2_p, b2_p)

    return out_tiles.reshape(n_pad, NC_PAD)[:n, :NUM_CLASSES]


# ---- parameters & reference --------------------------------------------------
def init_params(key, c_in):
    """Deterministic synthetic parameters (not a checkpoint load)."""
    # TODO(synk): the cnn backbone is injected in PyTorch (constructor arg);
    # this is a synthetic stand-in producing cnn_output_dim=512 features.
    k = jax.random.split(key, 6)
    kdim = KH * KW * c_in
    wc = jax.random.normal(k[0], (kdim, CONV_OUT), jnp.float32) * (1.0 / kdim) ** 0.5
    bc = jnp.zeros((1, CONV_OUT), jnp.float32)
    w1 = jax.random.normal(k[1], (CONV_OUT, CNN_OUTPUT_DIM), jnp.float32) * (1.0 / CONV_OUT) ** 0.5
    b1 = jax.random.normal(k[2], (1, CNN_OUTPUT_DIM), jnp.float32) * 0.01
    w2 = jax.random.normal(k[3], (CNN_OUTPUT_DIM, NUM_CLASSES), jnp.float32) * (1.0 / CNN_OUTPUT_DIM) ** 0.5
    b2 = jax.random.normal(k[4], (1, NUM_CLASSES), jnp.float32) * 0.01
    return wc, bc, w1, b1, w2, b2


def reference_forward(x_nchw, params, mxu_dtype=jnp.float32):
    """Pure-JAX reference.  mxu_dtype=bf16 mirrors the kernel's numerics."""
    wc, bc, w1, b1, w2, b2 = params
    d = mxu_dtype
    x_nhwc = jnp.transpose(x_nchw, (0, 2, 3, 1))
    patches = im2col_3x3_same(x_nhwc)
    conv = jnp.einsum("npk,kc->npc", patches.astype(d), wc.astype(d),
                      preferred_element_type=jnp.float32) + bc
    conv = jnp.maximum(conv, 0.0)
    pooled = jnp.mean(conv, axis=1)
    feats = jnp.dot(pooled.astype(d), w1.astype(d),
                    preferred_element_type=jnp.float32) + b1
    feats = jnp.maximum(feats, 0.0)
    return jnp.dot(feats.astype(d), w2.astype(d),
                   preferred_element_type=jnp.float32) + b2


if __name__ == "__main__":
    key = jax.random.PRNGKey(0)
    kx, kp = jax.random.split(key)

    N, C, H, W = 2, 4, 16, 16
    x = jax.random.normal(kx, (N, C, H, W), jnp.float32)
    params = init_params(kp, C)

    fwd = jax.jit(cnn_classifier_forward, static_argnames=("tn", "sub"))
    out = jax.block_until_ready(fwd(x, params))
    assert out.shape == (N, NUM_CLASSES)

    # Like-for-like reference (bf16 MXU operands, f32 accumulation).
    ref_bf16 = jax.block_until_ready(reference_forward(x, params, jnp.bfloat16))
    assert jnp.allclose(out, ref_bf16, atol=5e-3, rtol=5e-3), \
        "mismatch vs bf16-operand reference"

    # Full-f32 original-module semantics (loose tolerance for bf16 inputs).
    ref_f32 = jax.block_until_ready(reference_forward(x, params, jnp.float32))
    assert jnp.allclose(out, ref_f32, atol=5e-2, rtol=5e-2), \
        "mismatch vs f32 reference"

    print("KERNEL_OK")
</pallas_src>

<mosaic_0001>
module attributes {stable_mosaic.version = 11 : i64} {
  func.func @cnn_classifier_kernel(%arg0: i32, %arg1: memref<256x36xbf16, #tpu.memory_space<vmem>>, %arg2: memref<36x128xbf16, #tpu.memory_space<vmem>>, %arg3: memref<1x128xf32, #tpu.memory_space<vmem>>, %arg4: memref<128x512xbf16, #tpu.memory_space<vmem>>, %arg5: memref<1x512xf32, #tpu.memory_space<vmem>>, %arg6: memref<512x128xbf16, #tpu.memory_space<vmem>>, %arg7: memref<1x128xf32, #tpu.memory_space<vmem>>, %arg8: memref<1x1x128xf32, #tpu.memory_space<vmem>>, %arg9: memref<1x128xf32, #tpu.memory_space<vmem>>) attributes {dimension_semantics = [#tpu.dimension_semantics<parallel>], iteration_bounds = array<i64: 2>, scalar_prefetch = 0 : i64, scratch_operands = 1 : i64, tpu.core_type = #tpu.core_type<tc>, window_params = [{transform_indices = @transform_0, window_bounds = array<i64: 256, 36>}, {pipeline_mode = #tpu.pipeline_mode<synchronous>, transform_indices = @transform_1, window_bounds = array<i64: 36, 128>}, {pipeline_mode = #tpu.pipeline_mode<synchronous>, transform_indices = @transform_2, window_bounds = array<i64: 1, 128>}, {pipeline_mode = #tpu.pipeline_mode<synchronous>, transform_indices = @transform_3, window_bounds = array<i64: 128, 512>}, {pipeline_mode = #tpu.pipeline_mode<synchronous>, transform_indices = @transform_4, window_bounds = array<i64: 1, 512>}, {pipeline_mode = #tpu.pipeline_mode<synchronous>, transform_indices = @transform_5, window_bounds = array<i64: 512, 128>}, {pipeline_mode = #tpu.pipeline_mode<synchronous>, transform_indices = @transform_6, window_bounds = array<i64: 1, 128>}, {transform_indices = @transform_7, window_bounds = array<i64: 1, 1, 128>}]} {
    %c0_i32 = arith.constant 0 : i32
    %c256_i32 = arith.constant 256 : i32
    %0 = arith.muli %c0_i32, %c256_i32 : i32
    %1 = tpu.assume_multiple %0, 256 : i32
    %2 = arith.index_cast %1 : i32 to index
    %c0 = arith.constant 0 : index
    %3 = vector.load %arg1[%2, %c0] : memref<256x36xbf16, #tpu.memory_space<vmem>>, vector<256x36xbf16>
    %c0_0 = arith.constant 0 : index
    %c0_1 = arith.constant 0 : index
    %4 = vector.load %arg2[%c0_0, %c0_1] : memref<36x128xbf16, #tpu.memory_space<vmem>>, vector<36x128xbf16>
    %cst = arith.constant dense<0.000000e+00> : vector<256x128xf32>
    %5 = tpu.matmul %3, %4, %cst {dimension_numbers = #tpu.dot_dimension_numbers<[1], [0], [0], [1], [0, 0, 1, 1], [], []>} : vector<256x36xbf16>, vector<36x128xbf16>, vector<256x128xf32> -> vector<256x128xf32>
    %c0_2 = arith.constant 0 : index
    %c0_3 = arith.constant 0 : index
    %6 = vector.load %arg3[%c0_2, %c0_3] : memref<1x128xf32, #tpu.memory_space<vmem>>, vector<1x128xf32>
    %7 = vector.broadcast %6 : vector<1x128xf32> to vector<256x128xf32>
    %8 = arith.addf %5, %7 : vector<256x128xf32>
    %cst_4 = arith.constant 0.000000e+00 : f32
    %9 = vector.broadcast %cst_4 : f32 to vector<256x128xf32>
    %10 = arith.maximumf %8, %9 : vector<256x128xf32>
    %c1_i32 = arith.constant 1 : i32
    %11 = arith.muli %c0_i32, %c1_i32 : i32
    %12 = tpu.assume_multiple %11, 1 : i32
    %13 = vector.shape_cast %10 : vector<256x128xf32> to vector<1x256x128xf32>
    %cst_5 = arith.constant dense<0.000000e+00> : vector<1x128xf32>
    %14 = vector.multi_reduction <add>, %13, %cst_5 [1] : vector<1x256x128xf32> to vector<1x128xf32>
    %15 = arith.index_cast %12 : i32 to index
    %c0_6 = arith.constant 0 : index
    %16 = vector.load %arg9[%15, %c0_6] : memref<1x128xf32, #tpu.memory_space<vmem>>, vector<1x128xf32>
    tpu.vector_store %arg9[%15, %c0_6], %14 {strides = array<i32>} : memref<1x128xf32, #tpu.memory_space<vmem>>, vector<1x128xf32>,
    %c1_i32_7 = arith.constant 1 : i32
    %c0_8 = arith.constant 0 : index
    %c0_9 = arith.constant 0 : index
    %17 = vector.load %arg9[%c0_8, %c0_9] : memref<1x128xf32, #tpu.memory_space<vmem>>, vector<1x128xf32>
    %18 = arith.truncf %17 : vector<1x128xf32> to vector<1x128xbf16>
    %c0_10 = arith.constant 0 : index
    %c0_11 = arith.constant 0 : index
    %19 = vector.load %arg4[%c0_10, %c0_11] : memref<128x512xbf16, #tpu.memory_space<vmem>>, vector<128x512xbf16>
    %cst_12 = arith.constant dense<0.000000e+00> : vector<1x512xf32>
    %20 = tpu.matmul %18, %19, %cst_12 {dimension_numbers = #tpu.dot_dimension_numbers<[1], [0], [0], [1], [0, 0, 1, 1], [], []>} : vector<1x128xbf16>, vector<128x512xbf16>, vector<1x512xf32> -> vector<1x512xf32>
    %c0_13 = arith.constant 0 : index
    %c0_14 = arith.constant 0 : index
    %21 = vector.load %arg5[%c0_13, %c0_14] : memref<1x512xf32, #tpu.memory_space<vmem>>, vector<1x512xf32>
    %22 = arith.addf %20, %21 : vector<1x512xf32>
    %cst_15 = arith.constant 0.000000e+00 : f32
    %23 = vector.broadcast %cst_15 : f32 to vector<1x512xf32>
    %24 = arith.maximumf %22, %23 : vector<1x512xf32>
    %25 = arith.truncf %24 : vector<1x512xf32> to vector<1x512xbf16>
    %c0_16 = arith.constant 0 : index
    %c0_17 = arith.constant 0 : index
    %26 = vector.load %arg6[%c0_16, %c0_17] : memref<512x128xbf16, #tpu.memory_space<vmem>>, vector<512x128xbf16>
    %cst_18 = arith.constant dense<0.000000e+00> : vector<1x128xf32>
    %27 = tpu.matmul %25, %26, %cst_18 {dimension_numbers = #tpu.dot_dimension_numbers<[1], [0], [0], [1], [0, 0, 1, 1], [], []>} : vector<1x512xbf16>, vector<512x128xbf16>, vector<1x128xf32> -> vector<1x128xf32>
    %c0_19 = arith.constant 0 : index
    %c0_20 = arith.constant 0 : index
    %28 = vector.load %arg7[%c0_19, %c0_20] : memref<1x128xf32, #tpu.memory_space<vmem>>, vector<1x128xf32>
    %29 = arith.addf %27, %28 : vector<1x128xf32>
    %c0_21 = arith.constant 0 : index
    %c0_22 = arith.constant 0 : index
    %c0_23 = arith.constant 0 : index
    %30 = vector.load %arg8[%c0_21, %c0_22, %c0_23] : memref<1x1x128xf32, #tpu.memory_space<vmem>>, vector<1x1x128xf32>
    %31 = vector.shape_cast %30 : vector<1x1x128xf32> to vector<1x128xf32>
    %32 = vector.shape_cast %29 : vector<1x128xf32> to vector<1x1x128xf32>
    tpu.vector_store %arg8[%c0_21, %c0_22, %c0_23], %32 {strides = array<i32>} : memref<1x1x128xf32, #tpu.memory_space<vmem>>, vector<1x1x128xf32>,
    return
  }
  func.func @transform_0(%arg0: i32) -> (i32, i32) {
    %c0_i32 = arith.constant 0 : i32
    %c0_i32_0 = arith.constant 0 : i32
    return %arg0, %c0_i32 : i32, i32
  }
  func.func @transform_1(%arg0: i32) -> (i32, i32) {
    %c0_i32 = arith.constant 0 : i32
    %c0_i32_0 = arith.constant 0 : i32
    %c0_i32_1 = arith.constant 0 : i32
    return %c0_i32, %c0_i32_0 : i32, i32
  }
  func.func @transform_2(%arg0: i32) -> (i32, i32) {
    %c0_i32 = arith.constant 0 : i32
    %c0_i32_0 = arith.constant 0 : i32
    %c0_i32_1 = arith.constant 0 : i32
    return %c0_i32, %c0_i32_0 : i32, i32
  }
  func.func @transform_3(%arg0: i32) -> (i32, i32) {
    %c0_i32 = arith.constant 0 : i32
    %c0_i32_0 = arith.constant 0 : i32
    %c0_i32_1 = arith.constant 0 : i32
    return %c0_i32, %c0_i32_0 : i32, i32
  }
  func.func @transform_4(%arg0: i32) -> (i32, i32) {
    %c0_i32 = arith.constant 0 : i32
    %c0_i32_0 = arith.constant 0 : i32
    %c0_i32_1 = arith.constant 0 : i32
    return %c0_i32, %c0_i32_0 : i32, i32
  }
  func.func @transform_5(%arg0: i32) -> (i32, i32) {
    %c0_i32 = arith.constant 0 : i32
    %c0_i32_0 = arith.constant 0 : i32
    %c0_i32_1 = arith.constant 0 : i32
    return %c0_i32, %c0_i32_0 : i32, i32
  }
  func.func @transform_6(%arg0: i32) -> (i32, i32) {
    %c0_i32 = arith.constant 0 : i32
    %c0_i32_0 = arith.constant 0 : i32
    %c0_i32_1 = arith.constant 0 : i32
    return %c0_i32, %c0_i32_0 : i32, i32
  }
  func.func @transform_7(%arg0: i32) -> (i32, i32, i32) {
    %c0_i32 = arith.constant 0 : i32
    %c0_i32_0 = arith.constant 0 : i32
    %c0_i32_1 = arith.constant 0 : i32
    return %arg0, %c0_i32, %c0_i32_0 : i32, i32, i32
  }
}

</mosaic_0001>

<bundles_post_ra>
// kernel: cnn_classifier_forward.1
= control target key start
LH: loop header
LB: loop body
LE: loop exit
PB: predicated region body
PF: predicated region fallthrough
CT: control target
= control target key end

     0   :  { %12 = vsyncpa [#allocation4], 0  ;;  %s2249_s0 = inlined_call_operand.vmem [shape: bf16[512,36], index: 0, kind: input, shape index: {}]   ;;  %s2250_s1 = inlined_call_operand.vmem [shape: bf16[36,128], index: 1, kind: input, shape index: {}]   ;;  %s2251_s2 = inlined_call_operand.vmem [shape: f32[1,128], index: 2, kind: input, shape index: {}]   ;;  %s2252_s3 = inlined_call_operand.vmem [shape: bf16[128,512], index: 3, kind: input, shape index: {}]   ;;  %s2253_s4 = inlined_call_operand.vmem [shape: f32[1,512], index: 4, kind: input, shape index: {}]   ;;  %s2254_s5 = inlined_call_operand.vmem [shape: bf16[512,128], index: 5, kind: input, shape index: {}]   ;;  %s2255_s6 = inlined_call_operand.vmem [shape: f32[1,128], index: 6, kind: input, shape index: {}]   ;;  %s2256_s7 = inlined_call_operand.hbm [shape: f32[2,1,128], index: 7, kind: output, shape index: {}]  }
   0x1   :  { %14 = vsyncpa [#allocation4 + $0x1], 0  ;;  %s1870_s24 = smov 0   ;;  %s1872_s25 = smov 0  }
   0x2   :  { %s1874_s26 = smov 0   ;;  %s1876_s27 = smov 0  }
   0x3 LB: > { %s1891_s28 = sadd.s32 4294967295, %s1826_s27   ;;  %s1414_s29 = sadd.s32 4294967294, %s1826_s27   ;;  %s1826_s27 = sphi %s1876_s27, %s2262_s27   ;;  %s1822_s26 = sphi %s1874_s26, %s2261_s26   ;;  %s1818_s25 = sphi %s1872_s25, %s2260_s25   ;;  %s1814_s24 = sphi %s1870_s24, %s2259_s24  }
   0x4   : > { %s1895_s30 = sadd.s32 1, %s1826_s27   ;;  %s179_s8 = sadd.s32 1, %s1822_s26 }
   0x5   : > { %s176_s9 = ssub.s32 %s1826_s27, %s1895_s30  ;;  %p189_p0 = scmp.ne.s32.totalorder %s1822_s26, %s1818_s25 }
   0x6   : > { %p177_p1 = scmp.eq.s32.totalorder %s176_s9, 0  ;;  %p190_p2 = scmp.eq.s32.totalorder %s1891_s28, 1 }
   0x7   : > { %p195_p3 = scmp.ne.s32.totalorder %s1818_s25, %s1814_s24  ;;  %p196_p4 = scmp.eq.s32.totalorder %s1414_s29, 1 }
   0x8   : > { %s1906_s10 = scalar_select %p177_p1, %s1822_s26, %s179_s8  }
   0x9   : > { %p1908_p5 = por %p190_p2, %p189_p0  ;;  %p1912_p6 = por %p196_p4, %p195_p3 }
   0xa   : > { %p1417_p7 = scmp.ge.s32.totalorder %s1826_s27, 1  ;;  %p241_p8 = scmp.lt.s32.totalorder %s1826_s27, 3 }
   0xc   : > { %p242_p9 = pnand %p1417_p7, %p241_p8 }
   0xd   : > { %v1665_v0 = vld [vmem:[%s2250_s1] sm:$0xff] (!%p242_p9)   ;;  %v1666_v1 = vld [vmem:[%s2250_s1 + $0x8] sm:$0xff] (!%p242_p9)   ;;  %s1418_s17 = sshll.u32 (!%p242_p9), %s1891_s28, 5  ;;  %v1667_v2 = vld [vmem:[%s2250_s1 + $0x10] ss:$0 sps:$4 sm:$0x33] (!%p242_p9)  }
   0xe   : > { %245 = sbr.rel (%p242_p9) target bundleno = 812 (0x32c), region = 48  ;;  %1586 = vmatprep.subr.bf16.mxu0 (!%p242_p9), %v1665_v0  ;;  %p273_p10 = scmp.lt.s32.totalorder (!%p242_p9), %s1418_s17, 63  ;;  %vm467_vm0 = vcmask (!%p242_p9), 1041408   ;;  %vm418_vm1 = vcmask (!%p242_p9), 293888   ;;  %v1684_v20 = vld [vmem:[%s2252_s3 + $0x4] ss:$16 sps:$4 sm:$0xff] (!%p242_p9)  }
   0xf   : > { %1587 = vmatpush3.bf16.msra.mxu0 (!%p242_p9), %v1665_v0  ;;  %v469_v3 = vsel (!%p242_p9), %vm467_vm0, %v1667_v2, 0  ;;  %v1686_v21 = vld [vmem:[%s2252_s3] ss:$16 sps:$4 sm:$0xff] (!%p242_p9)   ;;  %918 = vmatprep.subr.bf16.mxu1 (!%p242_p9), %v1684_v20  ;;  %v1687_v22 = vld [vmem:[%s2252_s3 + $0x24] ss:$16 sps:$4 sm:$0xff] (!%p242_p9)   ;;  %v1828_v36 = vmov (!%p242_p9), 0  }
  0x10   : > { %1588 = vmatprep.subr.bf16.mxu0 (!%p242_p9), %v1666_v1  ;;  %919 = vmatpush1.bf16.msra.mxu1 (!%p242_p9), %v1686_v21  ;;  %v1689_v23 = vld [vmem:[%s2252_s3 + $0x20] ss:$16 sps:$4 sm:$0xff] (!%p242_p9)   ;;  %v1690_v24 = vld [vmem:[%s2252_s3 + $0x44] ss:$16 sps:$4 sm:$0xff] (!%p242_p9)   ;;  %v1710_v37 = vld [vmem:[%s2252_s3 + $0xc] ss:$16 sps:$4 sm:$0xff] (!%p242_p9)  }
  0x11   : > { %920 = vmatprep.subr.bf16.mxu1 (!%p242_p9), %v1687_v22  ;;  %v1692_v25 = vld [vmem:[%s2252_s3 + $0x40] ss:$16 sps:$4 sm:$0xff] (!%p242_p9)   ;;  %v1693_v26 = vld [vmem:[%s2252_s3 + $0x64] ss:$16 sps:$4 sm:$0xff] (!%p242_p9)   ;;  %950 = vmatprep.mubr.bf16.mxu1 (!%p242_p9), %v1828_v36  ;;  %v1734_v40 = vld [vmem:[%s2254_s5 + $0x48] sm:$0xff] (!%p242_p9)   ;;  %s270_s16 = sand.u32 (!%p242_p9), 1, %s1818_s25  }
  0x12   : > { %v1695_v27 = vld [vmem:[%s2252_s3 + $0x60] ss:$16 sps:$4 sm:$0xff] (!%p242_p9)   ;;  %v1696_v28 = vld [vmem:[%s2252_s3 + $0x84] ss:$16 sps:$4 sm:$0xff] (!%p242_p9)   ;;  %v1735_v42 = vld [vmem:[%s2254_s5 + $0x8] sm:$0xff] (!%p242_p9)   ;;  %s1520_s19 = sshll.u32 (!%p242_p9), %s1891_s28, 4 }
  0x13   : > { %1589 = vmatpush3.bf16.msra.mxu0 (!%p242_p9), %v1666_v1  ;;  %v1698_v29 = vld [vmem:[%s2252_s3 + $0x80] ss:$16 sps:$4 sm:$0xff] (!%p242_p9)   ;;  %v1699_v30 = vld [vmem:[%s2252_s3 + $0xa4] ss:$16 sps:$4 sm:$0xff] (!%p242_p9)   ;;  %v1738_v52 = vld [vmem:[%s2254_s5 + $0x58] sm:$0xff] (!%p242_p9)   ;;  %s2207_s29 = scalar_lea.hbm (!%p242_p9), %s2256_s7, %s1520_s19  ;;  %s1347_s8 = scalar_lea.sflag (!%p242_p9), [#allocation4], %s270_s16 }
  0x14   : > { %1624 = vmatprep.subr.msk.bf16.mxu0 (!%p242_p9), %vm467_vm0, %v1667_v2  ;;  %921 = vmatpush1.bf16.msra.mxu1 (!%p242_p9), %v1689_v23  ;;  %v1701_v31 = vld [vmem:[%s2252_s3 + $0xa0] ss:$16 sps:$4 sm:$0xff] (!%p242_p9)   ;;  %v1702_v32 = vld [vmem:[%s2252_s3 + $0xc4] ss:$16 sps:$4 sm:$0xff] (!%p242_p9)   ;;  %v1739_v56 = vld [vmem:[%s2254_s5 + $0x18] sm:$0xff] (!%p242_p9)   ;;  %s1829_s9 = smov (!%p242_p9), [#allocation3]  }
  0x15   : > { %s2264_s17 = smov (!%p273_p10, %s1418_s17), 63  ;;  %922 = vmatprep.subr.bf16.mxu1 %v1690_v24  ;;  %v1704_v33 = vld [vmem:[%s2252_s3 + $0xc0] ss:$16 sps:$4 sm:$0xff]   ;;  %v1705_v34 = vld [vmem:[%s2252_s3 + $0xe4] ss:$16 sps:$4 sm:$0xff]   ;;  %s1768_s13 = sshll.u32 %s1829_s9, 4  ;;  %s1769_s13 = int_to_ptr.vmem [resolvable:$false] %s1768_s13 }
  0x16   : > { %s1419_s20 = sshll.u32 %s2264_s17, 2  ;;  %v1707_v35 = vld [vmem:[%s2252_s3 + $0xe0] ss:$16 sps:$4 sm:$0xff]   ;;  %s1770_s14 = scalar_lea.vmem %s1769_s13, 32 }
  0x17   : > { %s1931_s23 = scalar_lea.vmem %s2249_s0, %s1419_s20  ;;  %1591 = vmatpush3.bf16.msra.mxu0 %v469_v3  ;;  %v1732_v38 = vld [vmem:[%s2254_s5 + $0x40] sm:$0xff]   ;;  %v1736_v44 = vld [vmem:[%s2254_s5 + $0x50] sm:$0xff]   ;;  %s271_s20 = scalar_lea.vmem [#allocation3], %s270_s16 }
  0x18   : > { %v1668_v4 = vld [vmem:[%s1931_s23] sm:$0xff]   ;;  %v1669_v5 = vld [vmem:[%s1931_s23 + $0x8] sm:$0xff]   ;;  %v1670_v6 = vld [vmem:[%s1931_s23 + $0x10] sm:$0xff]   ;;  %923 = vmatpush1.bf16.msra.mxu1 %v1692_v25  ;;  %1542 = vmatprep.subr.bf16.mxu0 %v1732_v38  ;;  %s1359_s21 = sshll.u32 %s271_s20, 4  ;;  %s2209_s21 = int_to_ptr.vmem [resolvable:$true] %s1359_s21 }
  0x19   : > { %1592 = vmatprep.mubr.msk.bf16.mxu0 %vm418_vm1, %v1668_v4  ;;  %v1671_v7 = vld [vmem:[%s1931_s23 + $0x18] sm:$0xff]   ;;  %v1672_v8 = vld [vmem:[%s1931_s23 + $0x20] sm:$0xff]   ;;  %v1673_v9 = vld [vmem:[%s1931_s23 + $0x28] sm:$0xff]   ;;  %924 = vmatprep.subr.bf16.mxu1 %v1693_v26  ;;  %s1764_s28 = scalar_lea.vmem %s2209_s21, 16  ;;  %p1771_p0 = scmp.lt.s32.totalorder %s2209_s21, %s1769_s13 }
  0x1a   : > { %1593 = vmatmul.mubr.msk.bf16.vlgmr.msra.gmra.mrb[0].mxu0 %vm418_vm1, %v1669_v5  ;;  %v1674_v10 = vld [vmem:[%s1931_s23 + $0x30] sm:$0xff]   ;;  %v1675_v11 = vld [vmem:[%s1931_s23 + $0x38] sm:$0xff]   ;;  %v1676_v12 = vld [vmem:[%s1931_s23 + $0x40] sm:$0xff]   ;;  %p1765_p11 = scmp.ne.s32.totalorder %s2209_s21, %s1764_s28  ;;  %p1772_p1 = scmp.lt.s32.totalorder %s1770_s14, %s1764_s28 }
  0x1b   : > { %1596 = vmatprep.mubr.msk.bf16.mxu0 %vm418_vm1, %v1670_v6  ;;  %v1677_v13 = vld [vmem:[%s1931_s23 + $0x48] sm:$0xff]   ;;  %v1678_v14 = vld [vmem:[%s1931_s23 + $0x50] sm:$0xff]   ;;  %v1679_v15 = vld [vmem:[%s1931_s23 + $0x58] sm:$0xff]  }
  0x1c   : > { %v1680_v16 = vld [vmem:[%s1931_s23 + $0x60] sm:$0xff]   ;;  %v1681_v17 = vld [vmem:[%s1931_s23 + $0x68] sm:$0xff]   ;;  %v1682_v18 = vld [vmem:[%s1931_s23 + $0x70] sm:$0xff]   ;;  %925 = vmatpush1.bf16.msra.mxu1 %v1695_v27  ;;  %p1766_p12 = pnand %p1765_p11, %p1908_p5  ;;  %p1773_p2 = por %p1772_p1, %p1771_p0 }
  0x1d   : > { %v1683_v19 = vld [vmem:[%s1931_s23 + $0x78] sm:$0xff]   ;;  %926 = vmatprep.subr.bf16.mxu1 %v1696_v28  ;;  %v1733_v39 = vld [vmem:[%s2254_s5] sm:$0xff]   ;;  %v1737_v49 = vld [vmem:[%s2254_s5 + $0x10] sm:$0xff]  }
  0x1e   : > { %v2029_v41 = vld [vmem:[%s2251_s2] ss:$0 sm:$0xff]  ;;  %1543 = vmatpush3.bf16.msra.mxu0 %v1733_v39  ;;  %p1767_p13 = pneg %p1766_p12 }
  0x1f   : > { %1544 = vmatprep.subr.bf16.mxu0 %v1734_v40  ;;  %v1740_v60 = vld [vmem:[%s2254_s5 + $0x60] sm:$0xff]  }
  0x20   : > { %927 = vmatpush1.bf16.msra.mxu1 %v1698_v29  ;;  %v1741_v3 = vld [vmem:[%s2254_s5 + $0x20] sm:$0xff]   ;;  %p1774_p3 = pnand %p1773_p2, %p1767_p13 }
  0x21   : > { %928 = vmatprep.subr.bf16.mxu1 %v1699_v30 }
  0x22   : > { %1597 = vmatmul.mubr.msk.bf16.gmra.mrb[4].mxu0 %vm418_vm1, %v1671_v7 }
  0x23   : > { %1600 = vmatprep.mubr.msk.bf16.mxu0 %vm418_vm1, %v1672_v8  ;;  %1545 = vmatpush3.bf16.msra.mxu0 %v1735_v42  ;;  %v1742_v8 = vld [vmem:[%s2254_s5 + $0x68] sm:$0xff]  }
  0x24   : > { %929 = vmatpush1.bf16.msra.mxu1 %v1701_v31  ;;  %1546 = vmatprep.subr.bf16.mxu0 %v1736_v44 }
  0x25   : > { %930 = vmatprep.subr.bf16.mxu1 %v1702_v32 }
  0x27   : > { %1547 = vmatpush3.bf16.msra.mxu0 %v1737_v49 }
  0x28   : > { %931 = vmatpush1.bf16.msra.mxu1 %v1704_v33  ;;  %1548 = vmatprep.subr.bf16.mxu0 %v1738_v52 }
  0x29   : > { %932 = vmatprep.subr.bf16.mxu1 %v1705_v34 }
  0x2a   : > { %1601 = vmatmul.mubr.msk.bf16.gmra.mrb[8].mxu0 %vm418_vm1, %v1673_v9 }
  0x2b   : > { %1604 = vmatprep.mubr.msk.bf16.mxu0 %vm418_vm1, %v1674_v10  ;;  %1549 = vmatpush3.bf16.msra.mxu0 %v1739_v56 }
  0x2c   : > { %933 = vmatpush1.bf16.msra.mxu1 %v1707_v35  ;;  %1550 = vmatprep.subr.bf16.mxu0 %v1740_v60 }
  0x2d   : > { %959 = vmatprep.subr.bf16.mxu1 %v1710_v37 }
  0x2f   : > { %1551 = vmatpush3.bf16.msra.mxu0 %v1741_v3 }
  0x30   : > { %1552 = vmatprep.subr.bf16.mxu0 %v1742_v8 }
  0x32   : > { %1605 = vmatmul.mubr.msk.bf16.gmra.mrb[12].mxu0 %vm418_vm1, %v1675_v11 }
  0x33   : > { %1608 = vmatprep.mubr.msk.bf16.mxu0 %vm418_vm1, %v1676_v12  ;;  %v1743_v12 = vld [vmem:[%s2254_s5 + $0x28] sm:$0xff]  }
  0x34   : > { %1553 = vmatpush3.bf16.msra.mxu0 %v1743_v12 }
  0x3a   : > { %1609 = vmatmul.mubr.msk.bf16.gmra.mrb[16].mxu0 %vm418_vm1, %v1677_v13 }
  0x3b   : > { %1612 = vmatprep.mubr.msk.bf16.mxu0 %vm418_vm1, %v1678_v14 }
  0x42   : > { %1613 = vmatmul.mubr.msk.bf16.gmra.mrb[20].mxu0 %vm418_vm1, %v1679_v15 }
  0x43   : > { %1616 = vmatprep.mubr.msk.bf16.mxu0 %vm418_vm1, %v1680_v16 }
  0x4a   : > { %1617 = vmatmul.mubr.msk.bf16.gmra.mrb[24].mxu0 %vm418_vm1, %v1681_v17 }
  0x4b   : > { %1620 = vmatprep.mubr.msk.bf16.mxu0 %vm418_vm1, %v1682_v18 }
  0x52   : > { %1621 = vmatmul.mubr.msk.bf16.gmra.mrb[28].mxu0 %vm418_vm1, %v1683_v19 }
  0xed   : > { %v1594_v43 = vpop.f32.mrb[0].mxu0 }
  0xee   : > { %v505_v45 = vpop.f32.mrb[1].mxu0  ;;  %v514_v50 = vadd.f32 %v1594_v43, %v2029_v41 }
  0xef   : > { %v506_v46 = vadd.f32 %v2029_v41, %v505_v45  ;;  %v1595_v47 = vpop.f32.mrb[2].mxu0 }
  0xf0   : > { %v508_v48 = vpop.f32.mrb[3].mxu0  ;;  %v517_v54 = vadd.f32 %v1595_v47, %v2029_v41  ;;  %v634_v57 = vmax.f32 %v514_v50, 0.0 }
  0xf1   : > { %v509_v51 = vadd.f32 %v2029_v41, %v508_v48  ;;  %v632_v53 = vmax.f32 %v506_v46, 0.0 }
  0xf2   : > { %v635_v62 = vmax.f32 %v517_v54, 0.0 }
  0xf3   : > { %v633_v55 = vmax.f32 %v509_v51, 0.0 }
  0xf5   : > { %v664_v58 = vadd.f32 %v633_v55, %v632_v53  ;;  %v1598_v59 = vpop.f32.mrb[4].mxu0 }
  0xf6   : > { %v521_v61 = vpop.f32.mrb[5].mxu0  ;;  %v530_v4 = vadd.f32 %v1598_v59, %v2029_v41 }
  0xf7   : > { %v665_v63 = vadd.f32 %v664_v58, %v634_v57  ;;  %v522_v0 = vadd.f32 %v2029_v41, %v521_v61  ;;  %v1599_v1 = vpop.f32.mrb[6].mxu0 }
  0xf8   : > { %v524_v2 = vpop.f32.mrb[7].mxu0  ;;  %v533_v10 = vadd.f32 %v1599_v1, %v2029_v41  ;;  %v638_v13 = vmax.f32 %v530_v4, 0.0 }
  0xf9   : > { %v636_v5 = vmax.f32 %v522_v0, 0.0  ;;  %v666_v6 = vadd.f32 %v665_v63, %v635_v62  ;;  %v525_v7 = vadd.f32 %v2029_v41, %v524_v2 }
  0xfa   : > { %v639_v17 = vmax.f32 %v533_v10, 0.0 }
  0xfb   : > { %v667_v9 = vadd.f32 %v666_v6, %v636_v5  ;;  %v637_v11 = vmax.f32 %v525_v7, 0.0 }
  0xfd   : > { %v668_v14 = vadd.f32 %v667_v9, %v637_v11  ;;  %v1602_v15 = vpop.f32.mrb[8].mxu0 }
  0xfe   : > { %v537_v16 = vpop.f32.mrb[9].mxu0  ;;  %v546_v22 = vadd.f32 %v1602_v15, %v2029_v41 }
  0xff   : > { %v669_v18 = vadd.f32 %v668_v14, %v638_v13  ;;  %v538_v19 = vadd.f32 %v2029_v41, %v537_v16  ;;  %v1603_v20 = vpop.f32.mrb[10].mxu0 }
 0x100   : > { %v540_v21 = vpop.f32.mrb[11].mxu0  ;;  %v549_v27 = vadd.f32 %v1603_v20, %v2029_v41  ;;  %v642_v29 = vmax.f32 %v546_v22, 0.0 }
 0x101   : > { %v640_v23 = vmax.f32 %v538_v19, 0.0  ;;  %v670_v24 = vadd.f32 %v669_v18, %v639_v17  ;;  %v541_v25 = vadd.f32 %v2029_v41, %v540_v21 }
 0x102   : > { %v643_v33 = vmax.f32 %v549_v27, 0.0 }
 0x103   : > { %v671_v26 = vadd.f32 %v670_v24, %v640_v23  ;;  %v641_v28 = vmax.f32 %v541_v25, 0.0 }
 0x105   : > { %v672_v30 = vadd.f32 %v671_v26, %v641_v28  ;;  %v1606_v31 = vpop.f32.mrb[12].mxu0 }
 0x106   : > { %v553_v32 = vpop.f32.mrb[13].mxu0  ;;  %v562_v39 = vadd.f32 %v1606_v31, %v2029_v41 }
 0x107   : > { %v673_v34 = vadd.f32 %v672_v30, %v642_v29  ;;  %v554_v35 = vadd.f32 %v2029_v41, %v553_v32  ;;  %v1607_v37 = vpop.f32.mrb[14].mxu0 }
 0x108   : > { %v556_v38 = vpop.f32.mrb[15].mxu0  ;;  %v565_v45 = vadd.f32 %v1607_v37, %v2029_v41  ;;  %v646_v47 = vmax.f32 %v562_v39, 0.0 }
 0x109   : > { %v644_v40 = vmax.f32 %v554_v35, 0.0  ;;  %v674_v42 = vadd.f32 %v673_v34, %v643_v33  ;;  %v557_v43 = vadd.f32 %v2029_v41, %v556_v38 }
 0x10a   : > { %v647_v51 = vmax.f32 %v565_v45, 0.0 }
 0x10b   : > { %v675_v44 = vadd.f32 %v674_v42, %v644_v40  ;;  %v645_v46 = vmax.f32 %v557_v43, 0.0 }
 0x10d   : > { %v676_v48 = vadd.f32 %v675_v44, %v645_v46  ;;  %v1610_v49 = vpop.f32.mrb[16].mxu0 }
 0x10e   : > { %v569_v50 = vpop.f32.mrb[17].mxu0  ;;  %v578_v56 = vadd.f32 %v1610_v49, %v2029_v41 }
 0x10f   : > { %v677_v52 = vadd.f32 %v676_v48, %v646_v47  ;;  %v570_v53 = vadd.f32 %v2029_v41, %v569_v50  ;;  %v1611_v54 = vpop.f32.mrb[18].mxu0 }
 0x110   : > { %v572_v55 = vpop.f32.mrb[19].mxu0  ;;  %v581_v61 = vadd.f32 %v1611_v54, %v2029_v41  ;;  %v650_v63 = vmax.f32 %v578_v56, 0.0 }
 0x111   : > { %v648_v57 = vmax.f32 %v570_v53, 0.0  ;;  %v678_v58 = vadd.f32 %v677_v52, %v647_v51  ;;  %v573_v59 = vadd.f32 %v2029_v41, %v572_v55 }
 0x112   : > { %v651_v3 = vmax.f32 %v581_v61, 0.0 }
 0x113   : > { %v679_v60 = vadd.f32 %v678_v58, %v648_v57  ;;  %v649_v62 = vmax.f32 %v573_v59, 0.0 }
 0x115   : > { %v680_v0 = vadd.f32 %v679_v60, %v649_v62  ;;  %v1614_v1 = vpop.f32.mrb[20].mxu0  ;;  %v1708_v60 = vld [vmem:[%s2252_s3 + $0x8] ss:$16 sps:$4 sm:$0xff]  }
 0x116   : > { %v585_v2 = vpop.f32.mrb[21].mxu0  ;;  %v594_v8 = vadd.f32 %v1614_v1, %v2029_v41  ;;  %v1714_v1 = vld [vmem:[%s2252_s3 + $0x48] ss:$16 sps:$4 sm:$0xff]  }
 0x117   : > { %v681_v4 = vadd.f32 %v680_v0, %v650_v63  ;;  %v586_v5 = vadd.f32 %v2029_v41, %v585_v2  ;;  %v1615_v6 = vpop.f32.mrb[22].mxu0  ;;  %v1711_v63 = vld [vmem:[%s2252_s3 + $0x28] ss:$16 sps:$4 sm:$0xff]   ;;  %v1716_v0 = vld [vmem:[%s2252_s3 + $0x4c] ss:$16 sps:$4 sm:$0xff]  }
 0x118   : > { %v588_v7 = vpop.f32.mrb[23].mxu0  ;;  %v597_v13 = vadd.f32 %v1615_v6, %v2029_v41  ;;  %v654_v15 = vmax.f32 %v594_v8, 0.0  ;;  %v1719_v2 = vld [vmem:[%s2252_s3 + $0x6c] ss:$16 sps:$4 sm:$0xff]   ;;  %v1723_v6 = vld [vmem:[%s2252_s3 + $0xa8] ss:$16 sps:$4 sm:$0xff]  }
 0x119   : > { %v652_v9 = vmax.f32 %v586_v5, 0.0  ;;  %v682_v10 = vadd.f32 %v681_v4, %v651_v3  ;;  %v589_v11 = vadd.f32 %v2029_v41, %v588_v7  ;;  %v1722_v3 = vld [vmem:[%s2252_s3 + $0x8c] ss:$16 sps:$4 sm:$0xff]   ;;  %v1720_v4 = vld [vmem:[%s2252_s3 + $0x88] ss:$16 sps:$4 sm:$0xff]  }
 0x11a   : > { %v655_v19 = vmax.f32 %v597_v13, 0.0  ;;  %v1725_v5 = vld [vmem:[%s2252_s3 + $0xac] ss:$16 sps:$4 sm:$0xff]   ;;  %v1726_v8 = vld [vmem:[%s2252_s3 + $0xc8] ss:$16 sps:$4 sm:$0xff]  }
 0x11b   : > { %v683_v12 = vadd.f32 %v682_v10, %v652_v9  ;;  %v653_v14 = vmax.f32 %v589_v11, 0.0  ;;  %v1728_v7 = vld [vmem:[%s2252_s3 + $0xcc] ss:$16 sps:$4 sm:$0xff]   ;;  %v1729_v10 = vld [vmem:[%s2252_s3 + $0xe8] ss:$16 sps:$4 sm:$0xff]   ;;  %v1744_v11 = vld [vmem:[%s2254_s5 + $0x70] sm:$0xff]  }
 0x11c   : > { %v1731_v9 = vld [vmem:[%s2252_s3 + $0xec] ss:$16 sps:$4 sm:$0xff]   ;;  %1554 = vmatprep.subr.bf16.mxu0 %v1744_v11 }
 0x11d   : > { %v684_v16 = vadd.f32 %v683_v12, %v653_v14  ;;  %v1618_v17 = vpop.f32.mrb[24].mxu0  ;;  %v1745_v12 = vld [vmem:[%s2254_s5 + $0x30] sm:$0xff]   ;;  %v1746_v13 = vld [vmem:[%s2254_s5 + $0x78] sm:$0xff]  }
 0x11e   : > { %v601_v18 = vpop.f32.mrb[25].mxu0  ;;  %v610_v24 = vadd.f32 %v1618_v17, %v2029_v41  ;;  %1555 = vmatpush3.bf16.msra.mxu0 %v1745_v12  ;;  %v1747_v14 = vld [vmem:[%s2254_s5 + $0x38] sm:$0xff]   ;;  %v1750_v17 = vld [vmem:[%s2254_s5 + $0xc8] sm:$0xff]  }
 0x11f   : > { %v685_v20 = vadd.f32 %v684_v16, %v654_v15  ;;  %v602_v21 = vadd.f32 %v2029_v41, %v601_v18  ;;  %v1619_v22 = vpop.f32.mrb[26].mxu0  ;;  %1556 = vmatprep.subr.bf16.mxu0 %v1746_v13  ;;  %v1748_v15 = vld [vmem:[%s2254_s5 + $0xc0] sm:$0xff]   ;;  %v1751_v18 = vld [vmem:[%s2254_s5 + $0x88] sm:$0xff]  }
 0x120   : > { %v604_v23 = vpop.f32.mrb[27].mxu0  ;;  %v613_v29 = vadd.f32 %v1619_v22, %v2029_v41  ;;  %v658_v31 = vmax.f32 %v610_v24, 0.0  ;;  %v1749_v16 = vld [vmem:[%s2254_s5 + $0x80] sm:$0xff]   ;;  %v1755_v22 = vld [vmem:[%s2254_s5 + $0x98] sm:$0xff]  }
 0x121   : > { %v656_v25 = vmax.f32 %v602_v21, 0.0  ;;  %v686_v26 = vadd.f32 %v685_v20, %v655_v19  ;;  %v605_v27 = vadd.f32 %v2029_v41, %v604_v23  ;;  %v1752_v19 = vld [vmem:[%s2254_s5 + $0xd0] sm:$0xff]   ;;  %v1754_v21 = vld [vmem:[%s2254_s5 + $0xd8] sm:$0xff]   ;;  %v1756_v23 = vld [vmem:[%s2254_s5 + $0xe0] sm:$0xff]  }
 0x122   : > { %v659_v35 = vmax.f32 %v613_v29, 0.0  ;;  %1557 = vmatpush3.bf16.msra.mxu0 %v1747_v14  ;;  %v1753_v20 = vld [vmem:[%s2254_s5 + $0x90] sm:$0xff]   ;;  %v1757_v24 = vld [vmem:[%s2254_s5 + $0xa0] sm:$0xff]   ;;  %v1762_v29 = vld [vmem:[%s2254_s5 + $0xf8] sm:$0xff]  }
 0x123   : > { %v687_v28 = vadd.f32 %v686_v26, %v656_v25  ;;  %v657_v30 = vmax.f32 %v605_v27, 0.0  ;;  %v1758_v25 = vld [vmem:[%s2254_s5 + $0xe8] sm:$0xff]   ;;  %v1760_v27 = vld [vmem:[%s2254_s5 + $0xf0] sm:$0xff]  }
 0x124   : > { %v1759_v26 = vld [vmem:[%s2254_s5 + $0xa8] sm:$0xff]  }
 0x125   : > { %v688_v32 = vadd.f32 %v687_v28, %v657_v30  ;;  %v1622_v33 = vpop.f32.mrb[28].mxu0  ;;  %v1761_v28 = vld [vmem:[%s2254_s5 + $0xb0] sm:$0xff]   ;;  %v1763_v30 = vld [vmem:[%s2254_s5 + $0xb8] sm:$0xff]  }
 0x126   : > { %v617_v34 = vpop.f32.mrb[29].mxu0  ;;  %v626_v42 = vadd.f32 %v1622_v33, %v2029_v41 }
 0x127   : > { %v689_v37 = vadd.f32 %v688_v32, %v658_v31  ;;  %v618_v38 = vadd.f32 %v2029_v41, %v617_v34  ;;  %v1623_v39 = vpop.f32.mrb[30].mxu0  ;;  %v898_v31 = vlaneseq  ;;  %v736_v34 = vld [vmem:[%s2253_s4] sm:$0xf] }
 0x128   : > { %v620_v40 = vpop.f32.mrb[31].mxu0  ;;  %v629_v47 = vadd.f32 %v1623_v39, %v2029_v41  ;;  %v662_v49 = vmax.f32 %v626_v42, 0.0 }
 0x129   : > { %v660_v43 = vmax.f32 %v618_v38, 0.0  ;;  %v690_v44 = vadd.f32 %v689_v37, %v659_v35  ;;  %v621_v45 = vadd.f32 %v2029_v41, %v620_v40  ;;  %v1713_v41 = vld [vmem:[%s2252_s3 + $0x2c] ss:$16 sps:$4 sm:$0xff]   ;;  %v899_v32 = vshrl.u32 %v898_v31, 7 }
 0x12a   : > { %v663_v51 = vmax.f32 %v629_v47, 0.0 }
 0x12b   : > { %v691_v46 = vadd.f32 %v690_v44, %v660_v43  ;;  %v661_v48 = vmax.f32 %v621_v45, 0.0  ;;  %v900_v33 = vsub.s32 0, %v899_v32  ;;  %v904_v35 = vsub.s32 1, %v899_v32 }
 0x12d   : > { %v692_v50 = vadd.f32 %v691_v46, %v661_v48  ;;  %v901_v37 = vrot.slane %v736_v34, %v900_v33  ;;  %v905_v38 = vrot.slane %v736_v34, %v904_v35 }
 0x12f   : > { %v693_v52 = vadd.f32 %v692_v50, %v662_v49  ;;  %v908_v50 = vsub.s32 2, %v899_v32 }
 0x131   : > { %v694_v53 = vadd.f32 %v693_v52, %v663_v51  ;;  %v912_v51 = vsub.s32 3, %v899_v32  ;;  %v909_v52 = vrot.slane %v736_v34, %v908_v50 }
 0x133   : > { %v695_v54 = vrot.slane %v694_v53, 4 }
 0x135   : > { %v696_v55 = vadd.f32 %v695_v54, %v694_v53  ;;  %v913_v53 = vrot.slane %v736_v34, %v912_v51 }
 0x137   : > { %v697_v56 = vrot.slane %v696_v55, 2 }
 0x139   : > { %v698_v57 = vadd.f32 %v697_v56, %v696_v55 }
 0x13b   : > { %v699_v58 = vrot.slane %v698_v57, 1 }
 0x13d   : > { %v700_v59 = vadd.f32 %v699_v58, %v698_v57 }
 0x13f   : > { %701 = vst [vmem:[#allocation2] sm:$0x1] %v700_v59 }
 0x146   : > { %v702_v61 = vld [vmem:[#allocation2] sm:$0x1] }
 0x147   : > { %v703_v62 = vpack.c.bf16 %v702_v61, %v702_v61 }
 0x149   : > { %951 = vmatmul.mubr.bf16.vlgmr.msra.gmra.mrb[0].mxu1 %v703_v62 }
 0x14a   : > { %960 = vmatpush1.bf16.msra.mxu1 %v1708_v60  ;;  %991 = vmatprep.mubr.bf16.mxu1 %v1828_v36  ;;  %v1717_v36 = vld [vmem:[%s2252_s3 + $0x68] ss:$16 sps:$4 sm:$0xff]  }
 0x14b   : > { %961 = vmatprep.subr.bf16.mxu1 %v1713_v41 }
 0x14e   : > { %962 = vmatpush1.bf16.msra.mxu1 %v1711_v63 }
 0x14f   : > { %963 = vmatprep.subr.bf16.mxu1 %v1716_v0 }
 0x152   : > { %964 = vmatpush1.bf16.msra.mxu1 %v1714_v1 }
 0x153   : > { %965 = vmatprep.subr.bf16.mxu1 %v1719_v2 }
 0x156   : > { %966 = vmatpush1.bf16.msra.mxu1 %v1717_v36 }
 0x157   : > { %967 = vmatprep.subr.bf16.mxu1 %v1722_v3  ;;  %v1072_v3 = vld [vmem:[%s2255_s6] sm:$0x1] }
 0x15a   : > { %968 = vmatpush1.bf16.msra.mxu1 %v1720_v4 }
 0x15b   : > { %969 = vmatprep.subr.bf16.mxu1 %v1725_v5 }
 0x15e   : > { %970 = vmatpush1.bf16.msra.mxu1 %v1723_v6 }
 0x15f   : > { %971 = vmatprep.subr.bf16.mxu1 %v1728_v7 }
 0x162   : > { %972 = vmatpush1.bf16.msra.mxu1 %v1726_v8 }
 0x163   : > { %973 = vmatprep.subr.bf16.mxu1 %v1731_v9 }
 0x166   : > { %974 = vmatpush1.bf16.msra.mxu1 %v1729_v10 }
 0x167   : > { %1564 = vmatprep.subr.bf16.mxu1 %v1748_v15 }
 0x169   : > { %992 = vmatmul.mubr.bf16.vlgmr.msra.gmra.mrb[4].mxu1 %v703_v62 }
 0x16a   : > { %1565 = vmatpush3.bf16.msra.mxu1 %v1749_v16 }
 0x16b   : > { %1566 = vmatprep.subr.bf16.mxu1 %v1750_v17 }
 0x16e   : > { %1567 = vmatpush3.bf16.msra.mxu1 %v1751_v18 }
 0x16f   : > { %1568 = vmatprep.subr.bf16.mxu1 %v1752_v19 }
 0x172   : > { %1569 = vmatpush3.bf16.msra.mxu1 %v1753_v20 }
 0x173   : > { %1570 = vmatprep.subr.bf16.mxu1 %v1754_v21 }
 0x176   : > { %1571 = vmatpush3.bf16.msra.mxu1 %v1755_v22 }
 0x177   : > { %1572 = vmatprep.subr.bf16.mxu1 %v1756_v23 }
 0x17a   : > { %1573 = vmatpush3.bf16.msra.mxu1 %v1757_v24 }
 0x17b   : > { %1574 = vmatprep.subr.bf16.mxu1 %v1758_v25 }
 0x17e   : > { %1575 = vmatpush3.bf16.msra.mxu1 %v1759_v26 }
 0x17f   : > { %1576 = vmatprep.subr.bf16.mxu1 %v1760_v27 }
 0x182   : > { %1577 = vmatpush3.bf16.msra.mxu1 %v1761_v28 }
 0x183   : > { %1578 = vmatprep.subr.bf16.mxu1 %v1762_v29 }
 0x186   : > { %1579 = vmatpush3.bf16.msra.mxu1 %v1763_v30 }
 0x21c   : > { %v952_v39 = vpop.f32.mrb[0].mxu1 }
 0x21d   : > { %v953_v40 = vadd.f32 %v952_v39, %v901_v37  ;;  %v954_v42 = vpop.f32.mrb[1].mxu1 }
 0x21e   : > { %v955_v43 = vadd.f32 %v954_v42, %v905_v38  ;;  %v956_v44 = vpop.f32.mrb[2].mxu1 }
 0x21f   : > { %v1000_v45 = vmax.f32 %v953_v40, 0.0  ;;  %v957_v46 = vpop.f32.mrb[3].mxu1 }
 0x220   : > { %v1001_v47 = vmax.f32 %v955_v43, 0.0 }
 0x221   : > { %v1004_v49 = vpack.c.bf16 %v1000_v45, %v1000_v45 }
 0x222   : > { %v1005_v48 = vpack.c.bf16 %v1001_v47, %v1001_v47 }
 0x224   : > { %1297 = vmatprep.mubr.bf16.mxu0 %v1005_v48 }
 0x225   : > { %1298 = vmatmul.mubr.bf16.vlgmr.msra.gmra.mrb[32].mxu0 %v1004_v49 }
 0x23c   : > { %v993_v54 = vpop.f32.mrb[4].mxu1 }
 0x23d   : > { %v994_v55 = vadd.f32 %v993_v54, %v909_v52  ;;  %v995_v56 = vpop.f32.mrb[5].mxu1 }
 0x23e   : > { %v996_v57 = vadd.f32 %v995_v56, %v913_v53  ;;  %v997_v58 = vpop.f32.mrb[6].mxu1 }
 0x23f   : > { %v1002_v59 = vmax.f32 %v994_v55, 0.0  ;;  %v998_v60 = vpop.f32.mrb[7].mxu1 }
 0x240   : > { %v1003_v61 = vmax.f32 %v996_v57, 0.0 }
 0x241   : > { %v1006_v41 = vpack.c.bf16 %v1002_v59, %v1002_v59 }
 0x242   : > { %v1007_v62 = vpack.c.bf16 %v1003_v61, %v1003_v61 }
 0x244   : > { %1337 = vmatprep.mubr.bf16.mxu1 %v1007_v62 }
 0x245   : > { %1338 = vmatmul.mubr.bf16.vlgmr.msra.gmra.mrb[8].mxu1 %v1006_v41 }
 0x2f8   : > { %v1558_v63 = vpop.f32.mrb[32].mxu0 }
 0x2f9   : > { %v1559_v0 = vpop.f32.mrb[33].mxu0 }
 0x2fa   : > { %v1560_v1 = vadd.f32 %v1559_v0, %v1558_v63  ;;  %v1561_v2 = vpop.f32.mrb[34].mxu0 }
 0x2fb   : > { %v1562_v36 = vpop.f32.mrb[35].mxu0 }
 0x2fc   : > { %v1300_v6 = vadd.f32 %v1560_v1, %v1072_v3 }
 0x318   : > { %v1580_v4 = vpop.f32.mrb[8].mxu1 }
 0x319   : > { %v1581_v5 = vpop.f32.mrb[9].mxu1 }
 0x31a   : > { %v1582_v7 = vadd.f32 %v1581_v5, %v1580_v4  ;;  %v1583_v8 = vpop.f32.mrb[10].mxu1 }
 0x31b   : > { %v1584_v9 = vpop.f32.mrb[11].mxu1 }
 0x31c   : > { %v1340_v10 = vadd.f32 %v1582_v7, %v1300_v6 }
 0x31e   : > { %1345 = vst [vmem:[%s271_s20] sm:$0x1] %v1340_v10 }
 0x31f   : > { %1777 = shalt.err (!%p1774_p3)
}
 0x320   : > { %s1778_s15 = scalar_lea.hbm %s2207_s29, 16  ;;  %s1782_s18 = scalar_lea.hbm %s2256_s7, 32 }
 0x321   : > { %p1779_p4 = scmp.ne.s32.totalorder %s2207_s29, %s1778_s15  ;;  %p1783_p9 = scmp.lt.u32.totalorder %s2207_s29, %s2256_s7 }
 0x322   : > { %p1784_p10 = scmp.lt.u32.totalorder %s1782_s18, %s1778_s15  ;;  %p1786_p12 = scmp.lt.u32.totalorder %s1778_s15, %s2207_s29 }
 0x323   : > { %p1780_p7 = pnand %p1779_p4, %p1908_p5 }
 0x324   : > { %p1785_p11 = por %p1784_p10, %p1783_p9 }
 0x325   : > { %p1781_p8 = pneg %p1780_p7 }
 0x326   : > { %p1787_p13 = por %p1786_p12, %p1785_p11 }
 0x328   : > { %p1788_p0 = pnand %p1787_p13, %p1781_p8 }
 0x32a   : > { %1791 = shalt.err (!%p1788_p0)
}
 0x32b   : > { %1625 = dma.vmem_to_hbm [thread:$0]  (%p1908_p5), %s2209_s21, 16, %s2207_s29, %s1347_s8  }
 0x32c PF: > { %p1631_p1 = scmp.ge.s32.totalorder %s1826_s27, 2  ;;  %s1371_s22 = sand.u32 1, %s1814_s24  }
 0x32d   : > { %s1372_s23 = scalar_lea.sflag [#allocation4], %s1371_s22 }
 0x32e   : > { %p1628_p2 = pnand %p1631_p1, %p1912_p6 }
 0x330   : > { %1809 = dma.done.wait (!%p1628_p2), %s1372_s23, 16  }
 0x331   : > { %1811 = vsyncadd (!%p1628_p2), %s1372_s23, 4294967280  ;;  %p17_p3 = scmp.ge.s32.totalorder %s1895_s30, 4   ;;  %s2259_s24 = smov %s1818_s25 }
 0x332   : > { %s2260_s25 = smov %s1822_s26  ;;  %s2261_s26 = smov %s1906_s10 }
 0x333   : > { %s2262_s27 = smov %s1895_s30  ;;  %19 = sbr.rel (!%p17_p3) target bundleno = 3 (0x3), region = 83 }
 0x33a   :  { %1376 = vsyncpa [#allocation4], 1 }
 0x33b   :  { %1378 = vsyncpa [#allocation4 + $0x1], 1 }

</bundles_post_ra>
